<compile_context>
chip_gen: v5e
topology: v5e:2x2
jax: 0.10.0
libtpu: 0.0.40
codegen_flags: <defaults>
</compile_context>

<pallas_src>
import functools

import jax
import jax.numpy as jnp
from jax import lax
from jax.experimental import pallas as pl
from jax.experimental.pallas import tpu as pltpu

LEAK = 0.2
BN_EPS = 1e-5
LANE = 128


def _round_up(x, m):
    return (x + m - 1) // m * m


def _vmem_limit_bytes():
    cap = 128 * 1024 * 1024
    try:
        info = pltpu.get_tpu_info()
        cap = int(getattr(info, "vmem_capacity_bytes", cap))
    except Exception:
        pass
    # leave headroom: v5e/v6e (128 MiB) -> 64 MiB, v7x (64 MiB) -> 32 MiB
    return min(cap // 2, 64 * 1024 * 1024)


VMEM_LIMIT = _vmem_limit_bytes()


def _pick_row_tile(ho, wp1, c_out_pad):
    """Largest divisor of Ho keeping the f32 accumulator tile small (<~2 MiB, <~1k rows)."""
    max_rows = max(1, min(1024 // wp1, (2 * 1024 * 1024) // (4 * wp1 * c_out_pad)))
    th = 1
    for d in range(1, ho + 1):
        if ho % d == 0 and d <= max_rows:
            th = d
    return th


# ---- pass 1: conv as 4 accumulated K=4*C_in MXU matmuls + per-tile BN partial stats ----
def _conv_stats_kernel(x_ref, w_ref, y_ref, stats_ref, *, th, wo, wp1, c_out_pad):
    # x_ref:     [Tin, 4*C_in]          bf16  parity-interleaved input rows (with halo)
    # w_ref:     [4, 4*C_in, C_out_pad] bf16  folded conv weights (group = 2*dh + dw)
    # y_ref:     [Th*(Wo+1), C_out_pad] bf16  conv rows (one junk col per (Wo+1))
    # stats_ref: [2, C_out_pad]         f32   per-tile (sum, sum_sq) over valid rows
    lt = th * wp1
    acc = jnp.zeros((lt, c_out_pad), jnp.float32)
    for g, s in enumerate((0, 1, wp1, wp1 + 1)):
        acc = acc + jnp.dot(x_ref[pl.ds(s, lt), :], w_ref[g],
                            preferred_element_type=jnp.float32)

    # rows with (l % (Wo+1)) == Wo are layout artifacts -> excluded from statistics
    lidx = lax.broadcasted_iota(jnp.int32, (lt, 1), 0)
    maskf = (lidx % wp1 != wo).astype(jnp.float32)
    am = acc * maskf
    stats_ref[0:1, :] = jnp.sum(am, axis=0, keepdims=True)
    stats_ref[1:2, :] = jnp.sum(am * acc, axis=0, keepdims=True)
    y_ref[...] = acc.astype(y_ref.dtype)


# ---- pass 2: y*scale + shift, LeakyReLU; junk column dropped here (lane-dense stores) ----
def _bn_lrelu_kernel(y_ref, scale_ref, shift_ref, o_ref, *, wo):
    # y_ref: [Th, Wo+1, C] bf16; scale/shift: [1, C] f32; o_ref: [Th, Wo, C] f32
    y = y_ref[:, :wo, :].astype(jnp.float32)
    z = y * scale_ref[...] + shift_ref[...]
    o_ref[...] = jnp.maximum(z, LEAK * z)


@jax.jit
def downsampling_forward(x, conv_w, bn_gamma, bn_beta):
    """x: [N, C_in, H, W] (NCHW), conv_w: [C_out, C_in, 4, 4], bn_gamma/bn_beta: [C_out].
    Returns [N, C_out, H//2, W//2] (NCHW)."""
    n, c_in, h, w = x.shape
    c_out = conv_w.shape[0]
    assert h % 2 == 0 and w % 2 == 0, "k=4,s=2,p=1 downsampling expects even H, W"
    ho, wo = h // 2, w // 2
    wp1 = wo + 1
    k4 = 4 * c_in
    c_out_pad = _round_up(c_out, LANE)

    th = _pick_row_tile(ho, wp1, c_out_pad)      # output rows per grid step
    n_t = ho // th
    lt = th * wp1                                # conv rows per tile (incl. junk col)
    tin = _round_up(lt + wp1 + 1, 8)             # input rows per tile incl. halo

    # ---- glue: pad + parity-interleave channels -> [N, (Ho+1)*(Wo+1), 4*C_in] (bf16) ----
    x_nhwc = jnp.transpose(x, (0, 2, 3, 1)).astype(jnp.bfloat16)            # [N,H,W,C]
    xp = jnp.pad(x_nhwc, ((0, 0), (1, 1), (1, 1), (0, 0)))                  # [N,H+2,W+2,C]
    xq = xp.reshape(n, ho + 1, 2, wp1, 2, c_in).transpose(0, 1, 3, 2, 4, 5)
    xq = xq.reshape(n, (ho + 1) * wp1, k4)
    rows_padded = (n_t - 1) * lt + tin
    xq = jnp.pad(xq, ((0, 0), (0, rows_padded - (ho + 1) * wp1), (0, 0)))
    # pre-chunk overlapping row tiles (halo = Wo+2 rows, ~1/Th input duplication)
    row_idx = jnp.arange(n_t)[:, None] * lt + jnp.arange(tin)[None, :]      # [nT, Tin]
    xq_t = xq[:, row_idx, :]                                                # [N,nT,Tin,4*C_in]

    # folded weights: [4, 4*C_in, C_out_pad]; group g = 2*dh+dw, row = (2*pr+pc)*C_in + c
    wt = jnp.transpose(conv_w, (2, 3, 1, 0)).reshape(2, 2, 2, 2, c_in, c_out)
    wt = jnp.transpose(wt, (0, 2, 1, 3, 4, 5)).reshape(4, k4, c_out)
    wt = jnp.pad(wt, ((0, 0), (0, 0), (0, c_out_pad - c_out))).astype(jnp.bfloat16)

    # ---- pass 1 ----
    kern1 = functools.partial(_conv_stats_kernel, th=th, wo=wo, wp1=wp1,
                              c_out_pad=c_out_pad)
    flops1 = 2 * 4 * n * n_t * lt * k4 * c_out_pad
    bytes1 = (xq_t.size * 2 + wt.size * 2 + n * n_t * lt * c_out_pad * 2
              + n * n_t * 2 * c_out_pad * 4)
    y1, stats = pl.pallas_call(
        kern1,
        grid=(n, n_t),
        in_specs=[
            pl.BlockSpec((None, None, tin, k4), lambda i, t: (i, t, 0, 0)),
            pl.BlockSpec((4, k4, c_out_pad), lambda i, t: (0, 0, 0)),
        ],
        out_specs=(
            pl.BlockSpec((None, None, lt, c_out_pad), lambda i, t: (i, t, 0, 0)),
            pl.BlockSpec((None, None, 2, c_out_pad), lambda i, t: (i, t, 0, 0)),
        ),
        out_shape=(
            jax.ShapeDtypeStruct((n, n_t, lt, c_out_pad), jnp.bfloat16),
            jax.ShapeDtypeStruct((n, n_t, 2, c_out_pad), jnp.float32),
        ),
        compiler_params=pltpu.CompilerParams(
            dimension_semantics=("parallel", "parallel"),
            vmem_limit_bytes=VMEM_LIMIT,
        ),
        cost_estimate=pl.CostEstimate(flops=flops1, transcendentals=0,
                                      bytes_accessed=bytes1),
    )(xq_t, wt)

    # ---- glue: global batch stats -> per-channel scale/shift (hoisted, f32) ----
    ssum = jnp.sum(stats, axis=(0, 1))                         # [2, C_out_pad]
    count = n * ho * wo
    mean = ssum[0] / count
    # E[x^2] - mean^2 in f32 with clamp; biased variance (PyTorch BN normalization)
    var = jnp.maximum(ssum[1] / count - mean * mean, 0.0)
    gamma = jnp.pad(bn_gamma.astype(jnp.float32), (0, c_out_pad - c_out))
    beta = jnp.pad(bn_beta.astype(jnp.float32), (0, c_out_pad - c_out))
    scale_v = gamma * lax.rsqrt(var + BN_EPS)
    shift_v = beta - mean * scale_v
    scale = scale_v.reshape(1, c_out_pad)
    shift = shift_v.reshape(1, c_out_pad)

    # ---- pass 2: normalize + LeakyReLU; junk column dropped by the output BlockSpec ----
    y1r = y1.reshape(n, n_t, th, wp1, c_out_pad)               # free reshape (contig split)
    kern2 = functools.partial(_bn_lrelu_kernel, wo=wo)
    bytes2 = y1.size * 2 + n * ho * wo * c_out_pad * 4 + 2 * c_out_pad * 4
    out = pl.pallas_call(
        kern2,
        grid=(n, n_t),
        in_specs=[
            pl.BlockSpec((None, None, th, wp1, c_out_pad), lambda i, t: (i, t, 0, 0, 0)),
            pl.BlockSpec((1, c_out_pad), lambda i, t: (0, 0)),
            pl.BlockSpec((1, c_out_pad), lambda i, t: (0, 0)),
        ],
        out_specs=pl.BlockSpec((None, None, th, wo, c_out_pad),
                               lambda i, t: (i, t, 0, 0, 0)),
        out_shape=jax.ShapeDtypeStruct((n, n_t, th, wo, c_out_pad), jnp.float32),
        compiler_params=pltpu.CompilerParams(
            dimension_semantics=("parallel", "parallel"),
            vmem_limit_bytes=VMEM_LIMIT,
        ),
        cost_estimate=pl.CostEstimate(flops=4 * n * ho * wo * c_out_pad,
                                      transcendentals=0, bytes_accessed=bytes2),
    )(y1r, scale, shift)

    out = out.reshape(n, ho, wo, c_out_pad)[:, :, :, :c_out]
    # TODO(synk): return NHWC (skip this extra HBM relayout) if the consumer allows it.
    return jnp.transpose(out, (0, 3, 1, 2))


def init_params(key, in_dim, out_dim):
    k_w, k_g = jax.random.split(key)
    # weights_init: Conv weight ~ N(0, 0.02); BN weight ~ N(1, 0.02); BN bias = 0
    conv_w = 0.02 * jax.random.normal(k_w, (out_dim, in_dim, 4, 4), jnp.float32)
    bn_gamma = 1.0 + 0.02 * jax.random.normal(k_g, (out_dim,), jnp.float32)
    bn_beta = jnp.zeros((out_dim,), jnp.float32)
    return conv_w, bn_gamma, bn_beta


def _reference_forward(x, conv_w, gamma, beta):
    y = lax.conv_general_dilated(
        x, conv_w, window_strides=(2, 2), padding=((1, 1), (1, 1)),
        dimension_numbers=("NCHW", "OIHW", "NCHW"))
    mean = jnp.mean(y, axis=(0, 2, 3), keepdims=True)
    var = jnp.mean((y - mean) ** 2, axis=(0, 2, 3), keepdims=True)
    yn = (y - mean) * lax.rsqrt(var + BN_EPS)
    yn = yn * gamma.reshape(1, -1, 1, 1) + beta.reshape(1, -1, 1, 1)
    return jnp.where(yn >= 0, yn, LEAK * yn)


if __name__ == "__main__":
    key = jax.random.PRNGKey(0)
    k_x, k_p = jax.random.split(key)

    N, C_in, C_out, H, W = 2, 4, 8, 16, 16
    x = jax.random.normal(k_x, (N, C_in, H, W), jnp.float32)
    conv_w, bn_gamma, bn_beta = init_params(k_p, C_in, C_out)

    out = downsampling_forward(x, conv_w, bn_gamma, bn_beta)
    jax.block_until_ready(out)
    assert out.shape == (N, C_out, H // 2, W // 2), out.shape

    # tolerance vs f32 reference (bf16 MXU operands + bf16 conv intermediate, f32 accum)
    ref = _reference_forward(x, conv_w, bn_gamma, bn_beta)
    max_err = float(jnp.max(jnp.abs(out - ref)))
    assert max_err < 8e-2, max_err

    print("KERNEL_OK")
</pallas_src>

<mosaic_0001>
module attributes {stable_mosaic.version = 11 : i64} {
  func.func @_conv_stats_kernel(%arg0: i32, %arg1: i32, %arg2: memref<1x1x88x16xbf16, #tpu.memory_space<vmem>>, %arg3: memref<4x16x128xbf16, #tpu.memory_space<vmem>>, %arg4: memref<1x1x72x128xbf16, #tpu.memory_space<vmem>>, %arg5: memref<1x1x2x128xf32, #tpu.memory_space<vmem>>) attributes {dimension_semantics = [#tpu.dimension_semantics<parallel>, #tpu.dimension_semantics<parallel>], iteration_bounds = array<i64: 2, 1>, scalar_prefetch = 0 : i64, scratch_operands = 0 : i64, tpu.core_type = #tpu.core_type<tc>, window_params = [{transform_indices = @transform_0, window_bounds = array<i64: 1, 1, 88, 16>}, {pipeline_mode = #tpu.pipeline_mode<synchronous>, transform_indices = @transform_1, window_bounds = array<i64: 4, 16, 128>}, {transform_indices = @transform_2, window_bounds = array<i64: 1, 1, 72, 128>}, {transform_indices = @transform_3, window_bounds = array<i64: 1, 1, 2, 128>}]} {
    %cst = arith.constant 0.000000e+00 : f32
    %0 = vector.broadcast %cst : f32 to vector<72x128xf32>
    %c0 = arith.constant 0 : index
    %c0_0 = arith.constant 0 : index
    %c0_1 = arith.constant 0 : index
    %c0_2 = arith.constant 0 : index
    %1 = vector.load %arg2[%c0, %c0_0, %c0_1, %c0_2] : memref<1x1x88x16xbf16, #tpu.memory_space<vmem>>, vector<1x1x72x16xbf16>
    %2 = vector.shape_cast %1 : vector<1x1x72x16xbf16> to vector<72x16xbf16>
    %c0_3 = arith.constant 0 : index
    %c0_4 = arith.constant 0 : index
    %c0_5 = arith.constant 0 : index
    %3 = vector.load %arg3[%c0_3, %c0_4, %c0_5] : memref<4x16x128xbf16, #tpu.memory_space<vmem>>, vector<1x16x128xbf16>
    %4 = vector.shape_cast %3 : vector<1x16x128xbf16> to vector<16x128xbf16>
    %cst_6 = arith.constant dense<0.000000e+00> : vector<72x128xf32>
    %5 = tpu.matmul %2, %4, %cst_6 {dimension_numbers = #tpu.dot_dimension_numbers<[1], [0], [0], [1], [0, 0, 1, 1], [], []>} : vector<72x16xbf16>, vector<16x128xbf16>, vector<72x128xf32> -> vector<72x128xf32>
    %6 = arith.addf %0, %5 : vector<72x128xf32>
    %c0_7 = arith.constant 0 : index
    %c0_8 = arith.constant 0 : index
    %c1 = arith.constant 1 : index
    %c0_9 = arith.constant 0 : index
    %7 = vector.load %arg2[%c0_7, %c0_8, %c1, %c0_9] : memref<1x1x88x16xbf16, #tpu.memory_space<vmem>>, vector<1x1x72x16xbf16>
    %8 = vector.shape_cast %7 : vector<1x1x72x16xbf16> to vector<72x16xbf16>
    %c1_10 = arith.constant 1 : index
    %c0_11 = arith.constant 0 : index
    %c0_12 = arith.constant 0 : index
    %9 = vector.load %arg3[%c1_10, %c0_11, %c0_12] : memref<4x16x128xbf16, #tpu.memory_space<vmem>>, vector<1x16x128xbf16>
    %10 = vector.shape_cast %9 : vector<1x16x128xbf16> to vector<16x128xbf16>
    %cst_13 = arith.constant dense<0.000000e+00> : vector<72x128xf32>
    %11 = tpu.matmul %8, %10, %cst_13 {dimension_numbers = #tpu.dot_dimension_numbers<[1], [0], [0], [1], [0, 0, 1, 1], [], []>} : vector<72x16xbf16>, vector<16x128xbf16>, vector<72x128xf32> -> vector<72x128xf32>
    %12 = arith.addf %6, %11 : vector<72x128xf32>
    %c0_14 = arith.constant 0 : index
    %c0_15 = arith.constant 0 : index
    %c9 = arith.constant 9 : index
    %c0_16 = arith.constant 0 : index
    %13 = vector.load %arg2[%c0_14, %c0_15, %c9, %c0_16] : memref<1x1x88x16xbf16, #tpu.memory_space<vmem>>, vector<1x1x72x16xbf16>
    %14 = vector.shape_cast %13 : vector<1x1x72x16xbf16> to vector<72x16xbf16>
    %c2 = arith.constant 2 : index
    %c0_17 = arith.constant 0 : index
    %c0_18 = arith.constant 0 : index
    %15 = vector.load %arg3[%c2, %c0_17, %c0_18] : memref<4x16x128xbf16, #tpu.memory_space<vmem>>, vector<1x16x128xbf16>
    %16 = vector.shape_cast %15 : vector<1x16x128xbf16> to vector<16x128xbf16>
    %cst_19 = arith.constant dense<0.000000e+00> : vector<72x128xf32>
    %17 = tpu.matmul %14, %16, %cst_19 {dimension_numbers = #tpu.dot_dimension_numbers<[1], [0], [0], [1], [0, 0, 1, 1], [], []>} : vector<72x16xbf16>, vector<16x128xbf16>, vector<72x128xf32> -> vector<72x128xf32>
    %18 = arith.addf %12, %17 : vector<72x128xf32>
    %c0_20 = arith.constant 0 : index
    %c0_21 = arith.constant 0 : index
    %c10 = arith.constant 10 : index
    %c0_22 = arith.constant 0 : index
    %19 = vector.load %arg2[%c0_20, %c0_21, %c10, %c0_22] : memref<1x1x88x16xbf16, #tpu.memory_space<vmem>>, vector<1x1x72x16xbf16>
    %20 = vector.shape_cast %19 : vector<1x1x72x16xbf16> to vector<72x16xbf16>
    %c3 = arith.constant 3 : index
    %c0_23 = arith.constant 0 : index
    %c0_24 = arith.constant 0 : index
    %21 = vector.load %arg3[%c3, %c0_23, %c0_24] : memref<4x16x128xbf16, #tpu.memory_space<vmem>>, vector<1x16x128xbf16>
    %22 = vector.shape_cast %21 : vector<1x16x128xbf16> to vector<16x128xbf16>
    %cst_25 = arith.constant dense<0.000000e+00> : vector<72x128xf32>
    %23 = tpu.matmul %20, %22, %cst_25 {dimension_numbers = #tpu.dot_dimension_numbers<[1], [0], [0], [1], [0, 0, 1, 1], [], []>} : vector<72x16xbf16>, vector<16x128xbf16>, vector<72x128xf32> -> vector<72x128xf32>
    %24 = arith.addf %18, %23 : vector<72x128xf32>
    %25 = tpu.iota {dimensions = array<i32: 0>} : vector<72x1xi32>
    %c9_i32 = arith.constant 9 : i32
    %c0_i32 = arith.constant 0 : i32
    %26 = arith.cmpi eq, %c9_i32, %c0_i32 : i32
    %c1_i32 = arith.constant 1 : i32
    %27 = arith.select %26, %c1_i32, %c9_i32 : i32
    %28 = vector.broadcast %27 : i32 to vector<72x1xi32>
    %29 = arith.remsi %25, %28 : vector<72x1xi32>
    %c0_i32_26 = arith.constant 0 : i32
    %30 = vector.broadcast %c0_i32_26 : i32 to vector<72x1xi32>
    %31 = arith.cmpi ne, %29, %30 : vector<72x1xi32>
    %c0_i32_27 = arith.constant 0 : i32
    %32 = vector.broadcast %c0_i32_27 : i32 to vector<72x1xi32>
    %33 = arith.cmpi slt, %29, %32 : vector<72x1xi32>
    %c0_i32_28 = arith.constant 0 : i32
    %34 = arith.cmpi slt, %27, %c0_i32_28 : i32
    %35 = vector.broadcast %34 : i1 to vector<72x1xi1>
    %36 = vector.broadcast %35 : vector<72x1xi1> to vector<72x1xi1>
    %37 = arith.xori %33, %36 : vector<72x1xi1>
    %38 = arith.andi %37, %31 : vector<72x1xi1>
    %39 = vector.broadcast %27 : i32 to vector<72x1xi32>
    %40 = arith.addi %29, %39 : vector<72x1xi32>
    %41 = arith.select %38, %40, %29 : vector<72x1xi1>, vector<72x1xi32>
    %c8_i32 = arith.constant 8 : i32
    %42 = vector.broadcast %c8_i32 : i32 to vector<72x1xi32>
    %43 = arith.cmpi ne, %41, %42 : vector<72x1xi32>
    %44 = arith.extui %43 : vector<72x1xi1> to vector<72x1xi32>
    %45 = arith.sitofp %44 : vector<72x1xi32> to vector<72x1xf32>
    %46 = vector.broadcast %45 : vector<72x1xf32> to vector<72x128xf32>
    %47 = arith.mulf %24, %46 : vector<72x128xf32>
    %cst_29 = arith.constant dense<0.000000e+00> : vector<128xf32>
    %48 = vector.multi_reduction <add>, %47, %cst_29 [0] : vector<72x128xf32> to vector<128xf32>
    %49 = vector.shape_cast %48 : vector<128xf32> to vector<1x128xf32>
    %c0_30 = arith.constant 0 : index
    %c0_31 = arith.constant 0 : index
    %c0_32 = arith.constant 0 : index
    %c0_33 = arith.constant 0 : index
    %50 = vector.load %arg5[%c0_30, %c0_31, %c0_32, %c0_33] : memref<1x1x2x128xf32, #tpu.memory_space<vmem>>, vector<1x1x1x128xf32>
    %51 = vector.shape_cast %50 : vector<1x1x1x128xf32> to vector<1x128xf32>
    %52 = vector.shape_cast %49 : vector<1x128xf32> to vector<1x1x1x128xf32>
    tpu.vector_store %arg5[%c0_30, %c0_31, %c0_32, %c0_33], %52 {strides = array<i32>} : memref<1x1x2x128xf32, #tpu.memory_space<vmem>>, vector<1x1x1x128xf32>,
    %53 = arith.mulf %47, %24 : vector<72x128xf32>
    %cst_34 = arith.constant dense<0.000000e+00> : vector<128xf32>
    %54 = vector.multi_reduction <add>, %53, %cst_34 [0] : vector<72x128xf32> to vector<128xf32>
    %55 = vector.shape_cast %54 : vector<128xf32> to vector<1x128xf32>
    %c0_35 = arith.constant 0 : index
    %c0_36 = arith.constant 0 : index
    %c1_37 = arith.constant 1 : index
    %c0_38 = arith.constant 0 : index
    %56 = vector.load %arg5[%c0_35, %c0_36, %c1_37, %c0_38] : memref<1x1x2x128xf32, #tpu.memory_space<vmem>>, vector<1x1x1x128xf32>
    %57 = vector.shape_cast %56 : vector<1x1x1x128xf32> to vector<1x128xf32>
    %58 = vector.shape_cast %55 : vector<1x128xf32> to vector<1x1x1x128xf32>
    tpu.vector_store %arg5[%c0_35, %c0_36, %c1_37, %c0_38], %58 {strides = array<i32>} : memref<1x1x2x128xf32, #tpu.memory_space<vmem>>, vector<1x1x1x128xf32>,
    %59 = arith.truncf %24 : vector<72x128xf32> to vector<72x128xbf16>
    %c0_39 = arith.constant 0 : index
    %c0_40 = arith.constant 0 : index
    %c0_41 = arith.constant 0 : index
    %c0_42 = arith.constant 0 : index
    %60 = vector.load %arg4[%c0_39, %c0_40, %c0_41, %c0_42] : memref<1x1x72x128xbf16, #tpu.memory_space<vmem>>, vector<1x1x72x128xbf16>
    %61 = vector.shape_cast %60 : vector<1x1x72x128xbf16> to vector<72x128xbf16>
    %62 = vector.shape_cast %59 : vector<72x128xbf16> to vector<1x1x72x128xbf16>
    tpu.vector_store %arg4[%c0_39, %c0_40, %c0_41, %c0_42], %62 {strides = array<i32>} : memref<1x1x72x128xbf16, #tpu.memory_space<vmem>>, vector<1x1x72x128xbf16>,
    return
  }
  func.func @transform_0(%arg0: i32, %arg1: i32) -> (i32, i32, i32, i32) {
    %c0_i32 = arith.constant 0 : i32
    %c0_i32_0 = arith.constant 0 : i32
    %c0_i32_1 = arith.constant 0 : i32
    return %arg0, %arg1, %c0_i32, %c0_i32_0 : i32, i32, i32, i32
  }
  func.func @transform_1(%arg0: i32, %arg1: i32) -> (i32, i32, i32) {
    %c0_i32 = arith.constant 0 : i32
    %c0_i32_0 = arith.constant 0 : i32
    %c0_i32_1 = arith.constant 0 : i32
    %c0_i32_2 = arith.constant 0 : i32
    return %c0_i32, %c0_i32_0, %c0_i32_1 : i32, i32, i32
  }
  func.func @transform_2(%arg0: i32, %arg1: i32) -> (i32, i32, i32, i32) {
    %c0_i32 = arith.constant 0 : i32
    %c0_i32_0 = arith.constant 0 : i32
    %c0_i32_1 = arith.constant 0 : i32
    return %arg0, %arg1, %c0_i32, %c0_i32_0 : i32, i32, i32, i32
  }
  func.func @transform_3(%arg0: i32, %arg1: i32) -> (i32, i32, i32, i32) {
    %c0_i32 = arith.constant 0 : i32
    %c0_i32_0 = arith.constant 0 : i32
    %c0_i32_1 = arith.constant 0 : i32
    return %arg0, %arg1, %c0_i32, %c0_i32_0 : i32, i32, i32, i32
  }
}

module attributes {stable_mosaic.version = 11 : i64} {
  func.func @_bn_lrelu_kernel(%arg0: i32, %arg1: i32, %arg2: memref<1x1x8x9x128xbf16, #tpu.memory_space<vmem>>, %arg3: memref<1x128xf32, #tpu.memory_space<vmem>>, %arg4: memref<1x128xf32, #tpu.memory_space<vmem>>, %arg5: memref<1x1x8x8x128xf32, #tpu.memory_space<vmem>>) attributes {dimension_semantics = [#tpu.dimension_semantics<parallel>, #tpu.dimension_semantics<parallel>], iteration_bounds = array<i64: 2, 1>, scalar_prefetch = 0 : i64, scratch_operands = 0 : i64, tpu.core_type = #tpu.core_type<tc>, window_params = [{transform_indices = @transform_0, window_bounds = array<i64: 1, 1, 8, 9, 128>}, {pipeline_mode = #tpu.pipeline_mode<synchronous>, transform_indices = @transform_1, window_bounds = array<i64: 1, 128>}, {pipeline_mode = #tpu.pipeline_mode<synchronous>, transform_indices = @transform_2, window_bounds = array<i64: 1, 128>}, {transform_indices = @transform_3, window_bounds = array<i64: 1, 1, 8, 8, 128>}]} {
    %c0 = arith.constant 0 : index
    %c0_0 = arith.constant 0 : index
    %c0_1 = arith.constant 0 : index
    %c0_2 = arith.constant 0 : index
    %c0_3 = arith.constant 0 : index
    %0 = vector.load %arg2[%c0, %c0_0, %c0_1, %c0_2, %c0_3] : memref<1x1x8x9x128xbf16, #tpu.memory_space<vmem>>, vector<1x1x8x8x128xbf16>
    %1 = vector.shape_cast %0 : vector<1x1x8x8x128xbf16> to vector<8x8x128xbf16>
    %2 = arith.extf %1 : vector<8x8x128xbf16> to vector<8x8x128xf32>
    %c0_4 = arith.constant 0 : index
    %c0_5 = arith.constant 0 : index
    %3 = vector.load %arg3[%c0_4, %c0_5] : memref<1x128xf32, #tpu.memory_space<vmem>>, vector<1x128xf32>
    %4 = vector.shape_cast %3 : vector<1x128xf32> to vector<1x1x128xf32>
    %5 = vector.broadcast %4 : vector<1x1x128xf32> to vector<8x8x128xf32>
    %6 = arith.mulf %2, %5 : vector<8x8x128xf32>
    %c0_6 = arith.constant 0 : index
    %c0_7 = arith.constant 0 : index
    %7 = vector.load %arg4[%c0_6, %c0_7] : memref<1x128xf32, #tpu.memory_space<vmem>>, vector<1x128xf32>
    %8 = vector.shape_cast %7 : vector<1x128xf32> to vector<1x1x128xf32>
    %9 = vector.broadcast %8 : vector<1x1x128xf32> to vector<8x8x128xf32>
    %10 = arith.addf %6, %9 : vector<8x8x128xf32>
    %cst = arith.constant 2.000000e-01 : f32
    %11 = vector.broadcast %cst : f32 to vector<8x8x128xf32>
    %12 = arith.mulf %11, %10 : vector<8x8x128xf32>
    %13 = arith.maximumf %10, %12 : vector<8x8x128xf32>
    %c0_8 = arith.constant 0 : index
    %c0_9 = arith.constant 0 : index
    %c0_10 = arith.constant 0 : index
    %c0_11 = arith.constant 0 : index
    %c0_12 = arith.constant 0 : index
    %14 = vector.load %arg5[%c0_8, %c0_9, %c0_10, %c0_11, %c0_12] : memref<1x1x8x8x128xf32, #tpu.memory_space<vmem>>, vector<1x1x8x8x128xf32>
    %15 = vector.shape_cast %14 : vector<1x1x8x8x128xf32> to vector<8x8x128xf32>
    %16 = vector.shape_cast %13 : vector<8x8x128xf32> to vector<1x1x8x8x128xf32>
    tpu.vector_store %arg5[%c0_8, %c0_9, %c0_10, %c0_11, %c0_12], %16 {strides = array<i32>} : memref<1x1x8x8x128xf32, #tpu.memory_space<vmem>>, vector<1x1x8x8x128xf32>,
    return
  }
  func.func @transform_0(%arg0: i32, %arg1: i32) -> (i32, i32, i32, i32, i32) {
    %c0_i32 = arith.constant 0 : i32
    %c0_i32_0 = arith.constant 0 : i32
    %c0_i32_1 = arith.constant 0 : i32
    %c0_i32_2 = arith.constant 0 : i32
    return %arg0, %arg1, %c0_i32, %c0_i32_0, %c0_i32_1 : i32, i32, i32, i32, i32
  }
  func.func @transform_1(%arg0: i32, %arg1: i32) -> (i32, i32) {
    %c0_i32 = arith.constant 0 : i32
    %c0_i32_0 = arith.constant 0 : i32
    %c0_i32_1 = arith.constant 0 : i32
    return %c0_i32, %c0_i32_0 : i32, i32
  }
  func.func @transform_2(%arg0: i32, %arg1: i32) -> (i32, i32) {
    %c0_i32 = arith.constant 0 : i32
    %c0_i32_0 = arith.constant 0 : i32
    %c0_i32_1 = arith.constant 0 : i32
    return %c0_i32, %c0_i32_0 : i32, i32
  }
  func.func @transform_3(%arg0: i32, %arg1: i32) -> (i32, i32, i32, i32, i32) {
    %c0_i32 = arith.constant 0 : i32
    %c0_i32_0 = arith.constant 0 : i32
    %c0_i32_1 = arith.constant 0 : i32
    %c0_i32_2 = arith.constant 0 : i32
    return %arg0, %arg1, %c0_i32, %c0_i32_0, %c0_i32_1 : i32, i32, i32, i32, i32
  }
}

</mosaic_0001>

<bundles_post_ra>
// kernel: downsampling_forward.3
= control target key start
LH: loop header
LB: loop body
LE: loop exit
PB: predicated region body
PF: predicated region fallthrough
CT: control target
= control target key end

     0   :  { %s446_s12 = smov 0   ;;  %s448_s13 = smov 0   ;;  %s492_s0 = inlined_call_operand.vmem [shape: bf16[2,1,8,9,128], index: 0, kind: input, shape index: {}]   ;;  %s493_s1 = inlined_call_operand.vmem [shape: f32[1,128], index: 1, kind: input, shape index: {}]   ;;  %s494_s2 = inlined_call_operand.vmem [shape: f32[1,128], index: 2, kind: input, shape index: {}]   ;;  %s495_s3 = inlined_call_operand.vmem [shape: f32[2,1,8,8,128], index: 3, kind: output, shape index: {}]  }
   0x1   :  { %s450_s14 = smov 0  }
   0x2 LB: > { %s25_s15 = sadd.s32 1, %s420_s13  ;;  %p367_p0 = scmp.ge.s32.totalorder %s424_s14, 1  ;;  %s424_s14 = sphi %s450_s14, %s13_s14   ;;  %s420_s13 = sphi %s448_s13, %s497_s13   ;;  %s416_s12 = sphi %s446_s12, %s496_s12  }
   0x3   : > { %p27_p1 = scmp.ge.s32.totalorder %s25_s15, 2  ;;  %p157_p2 = scmp.lt.s32.totalorder %s424_s14, 3 }
   0x5   : > { %s499_s15 = smov (%p27_p1, %s25_s15), 0  ;;  %p158_p3 = pnand %p367_p0, %p157_p2 }
   0x6   : > { %p189_p4 = scmp.lt.s32.totalorder (!%p158_p3), %s416_s12, 1 }
   0x7   : > { %161 = sbr.rel (%p158_p3) target bundleno = 34 (0x22), region = 32 }
   0xc   : > { %s501_s12 = smov (!%p189_p4, %s416_s12), 1  ;;  %v400_v0 = vld [vmem:[%s493_s1] ss:$0 sm:$0xff] }
   0xd   : > { %s374_s16 = sshll.u32 %s501_s12, 6  ;;  %v401_v1 = vld [vmem:[%s494_s2] ss:$0 sm:$0xff] }
   0xe   : > { %s197_s19 = scalar_lea.vmem %s492_s0, %s374_s16  ;;  %s206_s26 = scalar_lea.vmem %s495_s3, %s374_s16 }
   0xf   : > { %v207_v2 = vld [vmem:[%s197_s19] sm:$0xf]  ;;  %v208_v3 = vld [vmem:[%s197_s19 + $0x8] sm:$0xf]  ;;  %v209_v4 = vld [vmem:[%s197_s19 + $0x10] sm:$0xf] }
  0x10   : > { %v215_v5 = vunpack.c.l.bf16 %v207_v2  ;;  %v216_v6 = vunpack.c.l.bf16 %v208_v3  ;;  %v217_v7 = vunpack.c.l.bf16 %v209_v4  ;;  %v210_v8 = vld [vmem:[%s197_s19 + $0x18] sm:$0xf]  ;;  %v211_v9 = vld [vmem:[%s197_s19 + $0x20] sm:$0xf]  ;;  %v212_v10 = vld [vmem:[%s197_s19 + $0x28] sm:$0xf] }
  0x11   : > { %v218_v11 = vunpack.c.l.bf16 %v210_v8  ;;  %v219_v12 = vunpack.c.l.bf16 %v211_v9  ;;  %v220_v13 = vunpack.c.l.bf16 %v212_v10  ;;  %v213_v14 = vld [vmem:[%s197_s19 + $0x30] sm:$0xf]  ;;  %v214_v15 = vld [vmem:[%s197_s19 + $0x38] sm:$0xf] }
  0x12   : > { %v227_v16 = vmul.f32 %v400_v0, %v215_v5  ;;  %v228_v17 = vmul.f32 %v400_v0, %v216_v6  ;;  %v229_v18 = vmul.f32 %v400_v0, %v217_v7  ;;  %v221_v19 = vunpack.c.l.bf16 %v213_v14 }
  0x13   : > { %v230_v20 = vmul.f32 %v400_v0, %v218_v11  ;;  %v231_v21 = vmul.f32 %v400_v0, %v219_v12  ;;  %v232_v22 = vmul.f32 %v400_v0, %v220_v13  ;;  %v222_v23 = vunpack.c.l.bf16 %v214_v15 }
  0x14   : > { %v239_v24 = vadd.f32 %v401_v1, %v227_v16  ;;  %v240_v25 = vadd.f32 %v401_v1, %v228_v17  ;;  %v241_v26 = vadd.f32 %v401_v1, %v229_v18  ;;  %v233_v27 = vmul.f32 %v400_v0, %v221_v19 }
  0x15   : > { %v242_v28 = vadd.f32 %v401_v1, %v230_v20  ;;  %v243_v29 = vadd.f32 %v401_v1, %v231_v21  ;;  %v244_v30 = vadd.f32 %v401_v1, %v232_v22  ;;  %v234_v31 = vmul.f32 %v400_v0, %v222_v23 }
  0x16   : > { %v247_v32 = vmul.f32 0.2, %v239_v24  ;;  %v248_v33 = vmul.f32 0.2, %v240_v25  ;;  %v249_v34 = vmul.f32 0.2, %v241_v26  ;;  %v245_v35 = vadd.f32 %v401_v1, %v233_v27 }
  0x17   : > { %v250_v36 = vmul.f32 0.2, %v242_v28  ;;  %v251_v37 = vmul.f32 0.2, %v243_v29  ;;  %v252_v38 = vmul.f32 0.2, %v244_v30  ;;  %v246_v39 = vadd.f32 %v401_v1, %v234_v31 }
  0x18   : > { %v255_v40 = vmax.f32 %v239_v24, %v247_v32  ;;  %v256_v41 = vmax.f32 %v240_v25, %v248_v33  ;;  %v257_v42 = vmax.f32 %v241_v26, %v249_v34  ;;  %v253_v43 = vmul.f32 0.2, %v245_v35 }
  0x19   : > { %v258_v44 = vmax.f32 %v242_v28, %v250_v36  ;;  %v254_v45 = vmul.f32 0.2, %v246_v39  ;;  %v259_v46 = vmax.f32 %v243_v29, %v251_v37  ;;  %v260_v47 = vmax.f32 %v244_v30, %v252_v38 }
  0x1a   : > { %263 = vst [vmem:[%s206_s26] sm:$0xff] %v255_v40  ;;  %v261_v48 = vmax.f32 %v245_v35, %v253_v43 }
  0x1b   : > { %264 = vst [vmem:[%s206_s26 + $0x8] sm:$0xff] %v256_v41  ;;  %v262_v49 = vmax.f32 %v246_v39, %v254_v45 }
  0x1c   : > { %265 = vst [vmem:[%s206_s26 + $0x10] sm:$0xff] %v257_v42 }
  0x1d   : > { %266 = vst [vmem:[%s206_s26 + $0x18] sm:$0xff] %v258_v44 }
  0x1e   : > { %267 = vst [vmem:[%s206_s26 + $0x20] sm:$0xff] %v259_v46 }
  0x1f   : > { %268 = vst [vmem:[%s206_s26 + $0x28] sm:$0xff] %v260_v47 }
  0x20   : > { %269 = vst [vmem:[%s206_s26 + $0x30] sm:$0xff] %v261_v48 }
  0x21   : > { %270 = vst [vmem:[%s206_s26 + $0x38] sm:$0xff] %v262_v49 }
  0x22 PF: > { %s13_s14 = sadd.s32 1, %s424_s14   ;;  %s496_s12 = smov %s420_s13 }
  0x23   : > { %p10_p5 = scmp.ge.s32.totalorder %s13_s14, 4   ;;  %s497_s13 = smov %s499_s15 }
  0x25   :  { %12 = sbr.rel (!%p10_p5) target bundleno = 2 (0x2), region = 62 }

// kernel: downsampling_forward.2
= control target key start
LH: loop header
LB: loop body
LE: loop exit
PB: predicated region body
PF: predicated region fallthrough
CT: control target
= control target key end

     0   :  { %s1380_s12 = smov 0   ;;  %s1382_s13 = smov 0   ;;  %s1780_s0 = inlined_call_operand.vmem [shape: bf16[2,1,88,16], index: 0, kind: input, shape index: {}]   ;;  %s1781_s1 = inlined_call_operand.vmem [shape: bf16[4,16,128], index: 1, kind: input, shape index: {}]   ;;  %s1782_s2 = inlined_call_operand.vmem [shape: bf16[2,1,72,128], index: 2, kind: output, shape index: {0}]   ;;  %s1783_s3 = inlined_call_operand.vmem [shape: f32[2,1,2,128], index: 3, kind: output, shape index: {1}]  }
   0x1   :  { %s1384_s14 = smov 0  }
   0x2 LB: > { %s26_s15 = sadd.s32 1, %s1352_s13  ;;  %p1179_p0 = scmp.ge.s32.totalorder %s1356_s14, 1  ;;  %s1356_s14 = sphi %s1384_s14, %s14_s14   ;;  %s1352_s13 = sphi %s1382_s13, %s1811_s13   ;;  %s1348_s12 = sphi %s1380_s12, %s1810_s12  }
   0x3   : > { %p28_p1 = scmp.ge.s32.totalorder %s26_s15, 2  ;;  %p162_p2 = scmp.lt.s32.totalorder %s1356_s14, 3 }
   0x5   : > { %s1813_s15 = smov (%p28_p1, %s26_s15), 0  ;;  %p163_p3 = pnand %p1179_p0, %p162_p2 }
   0x6   : > { %p201_p4 = scmp.lt.s32.totalorder (!%p163_p3), %s1348_s12, 1 }
   0x7   : > { %166 = sbr.rel (%p163_p3) target bundleno = 244 (0xf4), region = 28 }
   0xc   : > { %v1272_v0 = vld [vmem:[%s1781_s1] sm:$0xff]  ;;  %v1279_v1 = vld [vmem:[%s1781_s1 + $0x18] sm:$0xff]  ;;  %v1273_v2 = vld [vmem:[%s1781_s1 + $0x8] sm:$0xff]  ;;  %s1815_s12 = smov (!%p201_p4, %s1348_s12), 1  ;;  %vm313_vm0 = vcmask 130048   ;;  %vm560_vm1 = vcmask 1046528  }
   0xd   : > { %v1278_v3 = vld [vmem:[%s1781_s1 + $0x10] sm:$0xff]  ;;  %387 = vmatpush.bf16.msra.mxu1 %v1272_v0  ;;  %598 = vmatpush.bf16.msra.mxu3 %v1279_v1  ;;  %s1303_s24 = smul.u32 44, %s1815_s12  ;;  %vm267_vm2 = vsmask.f32 7424  ;;  %s1182_s5 = sshll.u32 %s1815_s12, 1 }
   0xe   : > { %336 = vmatpush.bf16.msra.mxu0 %v1273_v2  ;;  %518 = vmatpush.bf16.msra.mxu2 %v1278_v3  ;;  %s1304_s28 = smul.u32 36, %s1815_s12  ;;  %s225_s8 = scalar_lea.vmem %s1783_s3, %s1182_s5 }
   0xf   : > { %s1416_s27 = scalar_lea.vmem %s1780_s0, %s1303_s24 }
  0x10   : > { %v1268_v4 = vld [vmem:[%s1416_s27] sm:$0xff]  ;;  %v1331_v6 = vld [vmem:[%s1416_s27 + $0x4] sm:$0xf0]  ;;  %v1274_v7 = vld [vmem:[%s1416_s27 + $0xc] sm:$0xff]  ;;  %s1568_s4 = scalar_lea.vmem %s1782_s2, %s1304_s28 }
  0x11   : > { %v414_v5 = vld [vmem:[%s1416_s27 + $0x4] sm:$0xff]   ;;  %v271_v10 = vshll.u32 %v1268_v4, 16  ;;  %1214 = vmatmul.msk.bf16.vlgmr.msra.gmra.mxu1 %vm313_vm0, %v1268_v4  ;;  %v269_v11 = vshrl.u32 %v1268_v4, 16  ;;  %v459_v13 = vshll.u32 %v1274_v7, 16  ;;  %v562_v15 = vrot.slane %v1274_v7, 1  ;;  %v1270_v27 = vld [vmem:[%s1416_s27 + $0x10] sm:$0xff] }
  0x12   : > { %v1332_v8 = vld [vmem:[%s1416_s27 + $0x4] sm:$0xe]  ;;  %v1269_v9 = vld [vmem:[%s1416_s27 + $0x8] sm:$0xff]  ;;  %v452_v18 = vshrl.u32 %v414_v5, 16  ;;  %v454_v19 = vshll.u32 %v414_v5, 16  ;;  %v1275_v29 = vld [vmem:[%s1416_s27 + $0x14] sm:$0xff] }
  0x13   : > { %v276_v12 = vshll.u32 %v1269_v9, 16  ;;  %v1333_v14 = vor.u32 %v1332_v8, %v1331_v6  ;;  %v273_v16 = vrot.slane %v271_v10, 1  ;;  %v461_v23 = vrot.slane %v459_v13, 1  ;;  %v1271_v42 = vld [vmem:[%s1416_s27 + $0x18] sm:$0xff]  ;;  %v235_v51 = vld [vmem:[%s1416_s27 + $0x20] sm:$0xf] }
  0x14   : > { %v456_v22 = vrot.slane %v454_v19, 1  ;;  %v280_v30 = vshrl.u32 %v1269_v9, 16  ;;  %v284_v31 = vshll.u32 %v1270_v27, 16  ;;  %v463_v32 = vshrl.u32 %v1274_v7, 16  ;;  %v1276_v43 = vld [vmem:[%s1416_s27 + $0x1c] sm:$0xff] }
  0x15   : > { %v278_v17 = vrot.slane %v276_v12, 1  ;;  %v561_v20 = vrot.slane %v1333_v14, 1  ;;  %v274_v21 = vor.u32 %v273_v16, %v269_v11  ;;  %v467_v33 = vshll.u32 %v1275_v29, 16  ;;  %v238_v52 = vld [vmem:[%s1416_s27 + $0x24] sm:$0x1] }
  0x16   : > { %v457_v26 = vor.u32 %v456_v22, %v452_v18  ;;  %v564_v34 = vrot.slane %v1275_v29, 1  ;;  %v286_v36 = vrot.slane %v284_v31, 1  ;;  %v465_v37 = vor.u32 %v463_v32, %v461_v23  ;;  %v1235_v61 = vld [vmem:[%s1416_s27 + $0x24] sm:$0xf]  ;;  %v1277_v62 = vld [vmem:[%s1416_s27 + $0x24] sm:$0x10] }
  0x17   : > { %v563_v24 = vsel %vm560_vm1, %v561_v20, %v562_v15  ;;  %v279_v25 = vsel %vm267_vm2, %v274_v21, %v278_v17  ;;  %v282_v35 = vor.u32 %v280_v30, %v278_v17  ;;  %v469_v38 = vrot.slane %v467_v33, 1 }
  0x18   : > { %1252 = vmatmul.msk.bf16.vlgmr.msra.gmra.mxu3 %vm313_vm0, %v563_v24  ;;  %1205 = vmatmul.msk.bf16.vlgmr.msra.gmra.mxu0 %vm313_vm0, %v279_v25  ;;  %v462_v28 = vsel %vm267_vm2, %v457_v26, %v461_v23  ;;  %v565_v39 = vsel %vm560_vm1, %v562_v15, %v564_v34  ;;  %v288_v44 = vshrl.u32 %v1270_v27, 16  ;;  %v292_v45 = vshll.u32 %v1271_v42, 16 }
  0x19   : > { %1241 = vmatmul.msk.bf16.vlgmr.msra.gmra.mxu2 %vm313_vm0, %v462_v28  ;;  %v287_v40 = vsel %vm267_vm2, %v282_v35, %v286_v36  ;;  %v470_v41 = vsel %vm267_vm2, %v465_v37, %v469_v38  ;;  %v471_v46 = vshrl.u32 %v1275_v29, 16  ;;  %v475_v47 = vshll.u32 %v1276_v43, 16 }
  0x1a   : > { %v566_v48 = vrot.slane %v1276_v43, 1  ;;  %v290_v49 = vor.u32 %v288_v44, %v286_v36  ;;  %v294_v50 = vrot.slane %v292_v45, 1  ;;  %v260_v57 = vunpack.c.l.b16 %v235_v51 }
  0x1b   : > { %v473_v53 = vor.u32 %v471_v46, %v469_v38  ;;  %v477_v54 = vrot.slane %v475_v47, 1  ;;  %v261_v58 = vunpack.c.l.b16 %v238_v52  ;;  %v1236_v63 = vor.u32 %v1277_v62, %v1235_v61 }
  0x1c   : > { %v567_v55 = vsel %vm560_vm1, %v564_v34, %v566_v48  ;;  %v295_v56 = vsel %vm267_vm2, %v290_v49, %v294_v50  ;;  %v296_v0 = vshrl.u32 %v1271_v42, 16  ;;  %v479_v2 = vshrl.u32 %v1276_v43, 16 }
  0x1d   : > { %v478_v59 = vsel %vm267_vm2, %v473_v53, %v477_v54  ;;  %v266_v60 = vpack.c.b16 %v261_v58, %v260_v57  ;;  %v483_v3 = vshll.u32 %v1236_v63, 16  ;;  %v568_v4 = vrot.slane %v1236_v63, 1 }
  0x1e   : > { %v298_v5 = vor.u32 %v296_v0, %v294_v50  ;;  %v481_v7 = vor.u32 %v479_v2, %v477_v54  ;;  %v362_v12 = vpack.c.b16 %v260_v57, %v260_v57  ;;  %v487_v14 = vshrl.u32 %v1236_v63, 16 }
  0x1f   : > { %v300_v1 = vshll.u32 %v266_v60, 16  ;;  %v485_v8 = vrot.slane %v483_v3, 1  ;;  %v304_v13 = vshrl.u32 %v266_v60, 16  ;;  %v633_v17 = vlaneseq }
  0x21   : > { %1215 = vmatmul.msk.bf16.gmra.mxu1 %vm313_vm0, %v1269_v9  ;;  %v302_v6 = vrot.slane %v300_v1, 1  ;;  %v569_v9 = vsel %vm560_vm1, %v566_v48, %v568_v4  ;;  %v486_v11 = vsel %vm267_vm2, %v481_v7, %v485_v8  ;;  %v489_v16 = vor.u32 %v487_v14, %v485_v8 }
  0x22   : > { %v1464_v18 = vshrl.u32 %v633_v17, 7 }
  0x23   : > { %v303_v10 = vsel %vm267_vm2, %v298_v5, %v302_v6  ;;  %v306_v15 = vor.u32 %v304_v13, %v302_v6 }
  0x24   : > { %v1467_v19 = vadd.s32 8, %v1464_v18  ;;  %v646_v20 = vand.u32 65535, %v1464_v18  ;;  %v647_v22 = vshrl.u32 %v1464_v18, 16  ;;  %v1474_v26 = vadd.s32 16, %v1464_v18 }
  0x25   : > { %v1486_v48 = vadd.s32 24, %v1464_v18  ;;  %v1506_v14 = vadd.s32 40, %v1464_v18 }
  0x26   : > { %v675_v21 = vand.u32 65535, %v1467_v19  ;;  %v650_v23 = vmul.u32 58254, %v646_v20  ;;  %v676_v24 = vshrl.u32 %v1467_v19, 16  ;;  %v1476_v28 = vmul.u32 14564, %v647_v22 }
  0x27   : > { %v704_v33 = vand.u32 65535, %v1474_v26  ;;  %v705_v38 = vshrl.u32 %v1474_v26, 16  ;;  %v652_v43 = vmul.u32 58254, %v647_v22  ;;  %v734_v0 = vshrl.u32 %v1486_v48, 16 }
  0x28   : > { %1253 = vmatmul.msk.bf16.gmra.mxu3 %vm313_vm0, %v565_v39  ;;  %1206 = vmatmul.msk.bf16.gmra.mxu0 %vm313_vm0, %v287_v40  ;;  %v679_v25 = vmul.u32 58254, %v675_v21  ;;  %v653_v29 = vshll.u32 %v650_v23, 16  ;;  %v678_v30 = vmul.u32 14564, %v675_v21  ;;  %v680_v31 = vmul.u32 14564, %v676_v24 }
  0x29   : > { %1242 = vmatmul.msk.bf16.gmra.mxu2 %vm313_vm0, %v470_v41  ;;  %v655_v34 = vshll.u32 %v1476_v28, 16  ;;  %v708_v39 = vmul.u32 58254, %v704_v33  ;;  %v681_v40 = vmul.u32 58254, %v676_v24  ;;  %v1358_v41 = vmov 0  }
  0x2a   : > { %v682_v32 = vshll.u32 %v679_v25, 16  ;;  %v684_v36 = vshll.u32 %v680_v31, 16  ;;  %v707_v45 = vmul.u32 14564, %v704_v33  ;;  %v1483_v46 = vmul.u32 14564, %v705_v38 }
  0x2b   : > { %v711_v47 = vshll.u32 %v708_v39, 16  ;;  %v683_v57 = vshrl.u32 %v679_v25, 16  ;;  %v710_v60 = vmul.u32 58254, %v705_v38  ;;  %v654_v61 = vshrl.u32 %v650_v23, 16 }
  0x2c   : > { %vm686_vm3 = vc.u32 %v678_v30, %v682_v32  ;;  %v688_v37 = vadd.s32 %v682_v32, %v678_v30  ;;  %v713_v54 = vshll.u32 %v1483_v46, 16  ;;  %v685_v2 = vshrl.u32 %v680_v31, 16 }
  0x2d   : > { %vm715_vm7 = vc.u32 %v707_v45, %v711_v47  ;;  %v656_v8 = vshrl.u32 %v1476_v28, 16  ;;  %v712_v17 = vshrl.u32 %v708_v39, 16  ;;  %v1511_v21 = vadd.s32 48, %v1464_v18 }
  0x2e   : > { %vm690_vm6 = vc.u32 %v688_v37, %v684_v36  ;;  %v716_v63 = vsel %vm715_vm7, 1, %v1358_v41  ;;  %v714_v33 = vshrl.u32 %v1483_v46, 16 }
  0x2f   : > { %v691_v50 = vsel %vm690_vm6, 1, %v1358_v41  ;;  %v718_v6 = vadd.s32 %v716_v63, %v710_v60  ;;  %v820_v36 = vand.u32 65535, %v1511_v21 }
  0x31   : > { %1216 = vmatmul.msk.bf16.gmra.mxu1 %vm313_vm0, %v1270_v27  ;;  %v649_v27 = vmul.u32 14564, %v646_v20 }
  0x33   : > { %v659_v35 = vadd.s32 %v653_v29, %v649_v27  ;;  %vm657_vm4 = vc.u32 %v649_v27, %v653_v29  ;;  %v791_v27 = vand.u32 65535, %v1506_v14 }
  0x34   : > { %v658_v44 = vsel %vm657_vm4, 1, %v1358_v41 }
  0x35   : > { %vm661_vm5 = vc.u32 %v659_v35, %v655_v34  ;;  %v660_v52 = vadd.s32 %v658_v44, %v652_v43  ;;  %v739_v35 = vmul.u32 58254, %v734_v0  ;;  %v1528_v43 = vadd.s32 56, %v1464_v18 }
  0x36   : > { %v662_v53 = vsel %vm661_vm5, 1, %v1358_v41  ;;  %v794_v60 = vmul.u32 14564, %v791_v27 }
  0x37   : > { %v664_v62 = vadd.s32 %v662_v53, %v660_v52  ;;  %v1537_v52 = vmul.u32 58254, %v820_v36 }
  0x38   : > { %1254 = vmatmul.msk.bf16.gmra.mxu3 %vm313_vm0, %v567_v55  ;;  %1207 = vmatmul.msk.bf16.gmra.mxu0 %vm313_vm0, %v295_v56  ;;  %v717_v55 = vadd.s32 %v711_v47, %v707_v45  ;;  %v733_v56 = vand.u32 65535, %v1486_v48 }
  0x39   : > { %1243 = vmatmul.msk.bf16.gmra.mxu2 %vm313_vm0, %v478_v59  ;;  %v1493_v59 = vadd.s32 32, %v1464_v18 }
  0x3a   : > { %vm719_vm8 = vc.u32 %v717_v55, %v713_v54  ;;  %v1497_v1 = vmul.u32 58254, %v733_v56 }
  0x3b   : > { %v763_v29 = vshrl.u32 %v1493_v59, 16 }
  0x3c   : > { %v740_v13 = vshll.u32 %v1497_v1, 16 }
  0x3d   : > { %v1533_v46 = vmul.u32 14564, %v763_v29  ;;  %v768_v54 = vmul.u32 58254, %v763_v29 }
  0x3f   : > { %v771_v63 = vshll.u32 %v1533_v46, 16 }
  0x41   : > { %1217 = vmatmul.msk.bf16.gmra.mxu1 %vm313_vm0, %v1271_v42  ;;  %v687_v42 = vsel %vm686_vm3, 1, %v1358_v41 }
  0x42   : > { %v689_v49 = vadd.s32 %v687_v42, %v681_v40  ;;  %v792_v40 = vshrl.u32 %v1506_v14, 16  ;;  %v1525_v42 = vmul.u32 58254, %v791_v27 }
  0x44   : > { %v693_v58 = vadd.s32 %v691_v50, %v689_v49  ;;  %v1540_v55 = vmul.u32 14564, %v792_v40 }
  0x46   : > { %v694_v3 = vadd.s32 %v693_v58, %v683_v57 }
  0x48   : > { %1255 = vmatmul.msk.bf16.gmra.mxu3 %vm313_vm0, %v569_v9  ;;  %1208 = vmatmul.msk.bf16.gmra.mxu0 %vm313_vm0, %v303_v10  ;;  %v665_v9 = vadd.s32 %v664_v62, %v654_v61  ;;  %v720_v10 = vsel %vm719_vm8, 1, %v1358_v41  ;;  %v798_v61 = vshll.u32 %v1525_v42, 16  ;;  %v741_v62 = vshrl.u32 %v1497_v1, 16 }
  0x49   : > { %1244 = vmatmul.msk.bf16.gmra.mxu2 %vm313_vm0, %v486_v11  ;;  %v736_v11 = vmul.u32 14564, %v733_v56  ;;  %v722_v20 = vadd.s32 %v720_v10, %v718_v6  ;;  %v821_v56 = vshrl.u32 %v1511_v21, 16  ;;  %v823_v6 = vmul.u32 14564, %v820_v36 }
  0x4a   : > { %v1513_v22 = vadd.s32 %v665_v9, %v656_v8  ;;  %v827_v8 = vshll.u32 %v1537_v52, 16  ;;  %vm802_vm12 = vc.u32 %v794_v60, %v798_v61 }
  0x4b   : > { %vm744_vm9 = vc.u32 %v736_v11, %v740_v13  ;;  %v746_v25 = vadd.s32 %v740_v13, %v736_v11  ;;  %v723_v34 = vadd.s32 %v722_v20, %v712_v17  ;;  %v1554_v1 = vmul.u32 14564, %v821_v56 }
  0x4c   : > { %v745_v39 = vsel %vm744_vm9, 1, %v1358_v41  ;;  %v667_v44 = vshrl.u32 %v1513_v22, 3  ;;  %v804_v20 = vadd.s32 %v798_v61, %v794_v60  ;;  %vm831_vm14 = vc.u32 %v823_v6, %v827_v8 }
  0x4d   : > { %v1535_v49 = vadd.s32 %v723_v34, %v714_v33  ;;  %v747_v50 = vadd.s32 %v745_v39, %v739_v35  ;;  %v833_v33 = vadd.s32 %v827_v8, %v823_v6  ;;  %v1573_v34 = vadd.s32 64, %v1464_v18 }
  0x4e   : > { %v832_v39 = vsel %vm831_vm14, 1, %v1358_v41 }
  0x51   : > { %1218 = vmatmul.msk.bf16.gmra.mxu1 %vm313_vm0, %v362_v12  ;;  %v1502_v12 = vmul.u32 14564, %v734_v0 }
  0x53   : > { %v742_v24 = vshll.u32 %v1502_v12, 16 }
  0x55   : > { %vm748_vm10 = vc.u32 %v746_v25, %v742_v24 }
  0x56   : > { %v749_v53 = vsel %vm748_vm10, 1, %v1358_v41 }
  0x57   : > { %v751_v11 = vadd.s32 %v749_v53, %v747_v50 }
  0x58   : > { %1256 = vmatmul.msk.bf16.gmra.mxu3 %vm313_vm0, %v568_v4  ;;  %1209 = vmatmul.msk.bf16.gmra.mxu0 %vm313_vm0, %v306_v15  ;;  %v762_v4 = vand.u32 65535, %v1493_v59  ;;  %v695_v15 = vadd.s32 %v694_v3, %v685_v2  ;;  %v850_v2 = vshrl.u32 %v1528_v43, 16 }
  0x59   : > { %1245 = vmatmul.msk.bf16.gmra.mxu2 %vm313_vm0, %v489_v16 }
  0x5a   : > { %v1508_v16 = vmul.u32 58254, %v762_v4  ;;  %v696_v28 = vshrl.u32 %v695_v15, 3  ;;  %v765_v30 = vmul.u32 14564, %v762_v4  ;;  %v800_v15 = vshll.u32 %v1540_v55, 16 }
  0x5b   : > { %v1558_v27 = vmul.u32 14564, %v850_v2 }
  0x5c   : > { %v769_v31 = vshll.u32 %v1508_v16, 16  ;;  %v1531_v45 = vmul.u32 9, %v696_v28  ;;  %vm806_vm15 = vc.u32 %v804_v20, %v800_v15 }
  0x5e   : > { %vm773_vm11 = vc.u32 %v765_v30, %v769_v31  ;;  %v775_v0 = vadd.s32 %v769_v31, %v765_v30  ;;  %v803_v31 = vsel %vm802_vm12, 1, %v1358_v41 }
  0x5f   : > { %v774_v58 = vsel %vm773_vm11, 1, %v1358_v41 }
  0x60   : > { %v776_v13 = vadd.s32 %v774_v58, %v768_v54  ;;  %vm777_vm13 = vc.u32 %v775_v0, %v771_v63  ;;  %v725_v54 = vshrl.u32 %v1535_v49, 3  ;;  %v752_v58 = vadd.s32 %v751_v11, %v741_v62 }
  0x61   : > { %v778_v36 = vsel %vm777_vm13, 1, %v1358_v41  ;;  %v855_v63 = vmul.u32 58254, %v850_v2  ;;  %v878_v0 = vand.u32 65535, %v1573_v34  ;;  %v879_v62 = vshrl.u32 %v1573_v34, 16 }
  0x62   : > { %v799_v11 = vshrl.u32 %v1525_v42, 16 }
  0x63   : > { %v881_v8 = vmul.u32 14564, %v878_v0  ;;  %v1607_v20 = vmul.u32 14564, %v879_v62 }
  0x8e   : > { %v389_v51 = vpop.f32.mrf.mxu1 }
  0x95   : > { %v338_v5 = vpop.f32.mrf.mxu0 }
  0x96   : > { %v391_v7 = vpop.f32.mrf.mxu1  ;;  %v390_v47 = vadd.f32 %v389_v51, %v338_v5  ;;  %v849_v51 = vand.u32 65535, %v1528_v43 }
  0x98   : > { %v1556_v24 = vmul.u32 58254, %v849_v51  ;;  %v852_v25 = vmul.u32 14564, %v849_v51 }
  0x9a   : > { %v856_v30 = vshll.u32 %v1556_v24, 16 }
  0x9b   : > { %v600_v23 = vpop.f32.mrf.mxu3 }
  0x9c   : > { %v520_v37 = vpop.f32.mrf.mxu2  ;;  %vm1582_vm0 = vc.u32 %v852_v25, %v856_v30  ;;  %v862_v50 = vadd.s32 %v856_v30, %v852_v25  ;;  %v772_v30 = vshrl.u32 %v1533_v46, 16 }
  0x9d   : > { %v340_v32 = vpop.f32.mrf.mxu0  ;;  %v544_v4 = vadd.f32 %v520_v37, %v390_v47  ;;  %v826_v37 = vmul.u32 58254, %v821_v56  ;;  %v807_v56 = vsel %vm806_vm15, 1, %v1358_v41  ;;  %v861_v49 = vsel %vm1582_vm0, 1, %v1358_v41 }
  0x9e   : > { %v1521_v38 = vpop.f32.mrf.mxu1  ;;  %v392_v3 = vadd.f32 %v391_v7, %v340_v32  ;;  %v797_v7 = vmul.u32 58254, %v792_v40  ;;  %v829_v32 = vshll.u32 %v1554_v1, 16  ;;  %v858_v40 = vshll.u32 %v1558_v27, 16 }
  0x9f   : > { %v1560_v28 = vadd.f32 %v600_v23, %v544_v4  ;;  %v780_v4 = vadd.s32 %v778_v36, %v776_v13  ;;  %v834_v6 = vadd.s32 %v832_v39, %v826_v37  ;;  %v801_v39 = vshrl.u32 %v1540_v55, 16 }
  0xa0   : > { %v805_v60 = vadd.s32 %v803_v31, %v797_v7  ;;  %vm835_vm1 = vc.u32 %v833_v33, %v829_v32  ;;  %vm1597_vm2 = vc.u32 %v862_v50, %v858_v40  ;;  %v828_v32 = vshrl.u32 %v1537_v52, 16 }
  0xa1   : > { %v836_v13 = vsel %vm835_vm1, 1, %v1358_v41  ;;  %v887_v33 = vshll.u32 %v1607_v20, 16  ;;  %v857_v52 = vshrl.u32 %v1556_v24, 16  ;;  %v830_v55 = vshrl.u32 %v1554_v1, 16 }
  0xa2   : > { %v838_v42 = vadd.s32 %v836_v13, %v834_v6 }
  0xa3   : > { %v602_v57 = vpop.f32.mrf.mxu3 }
  0xa4   : > { %v522_v9 = vpop.f32.mrf.mxu2 }
  0xa5   : > { %v343_v5 = vpop.f32.mrf.mxu0  ;;  %v545_v17 = vadd.f32 %v522_v9, %v392_v3  ;;  %v770_v3 = vshrl.u32 %v1508_v16, 16  ;;  %v1602_v9 = vmul.u32 58254, %v878_v0  ;;  %v809_v16 = vadd.s32 %v807_v56, %v805_v60 }
  0xa6   : > { %v1551_v10 = vpop.f32.mrf.mxu1  ;;  %v395_v2 = vadd.f32 %v1521_v38, %v343_v5  ;;  %v865_v38 = vsel %vm1597_vm2, 1, %v1358_v41  ;;  %v884_v5 = vmul.u32 58254, %v879_v62  ;;  %v668_v60 = vmul.u32 9, %v667_v44 }
  0xa7   : > { %v1562_v29 = vadd.f32 %v602_v57, %v545_v17  ;;  %v743_v57 = vshrl.u32 %v1502_v12, 16  ;;  %v863_v17 = vadd.s32 %v861_v49, %v855_v63  ;;  %v885_v7 = vshll.u32 %v1602_v9, 16 }
  0xa8   : > { %v781_v31 = vadd.s32 %v780_v4, %v770_v3  ;;  %v810_v40 = vadd.s32 %v809_v16, %v799_v11  ;;  %v839_v56 = vadd.s32 %v838_v42, %v828_v32  ;;  %v726_v44 = vmul.u32 9, %v725_v54 }
  0xa9   : > { %v1283_v23 = vpack.c.bf16 %v1562_v29, %v1560_v28  ;;  %v753_v15 = vadd.s32 %v752_v58, %v743_v57  ;;  %vm889_vm3 = vc.u32 %v881_v8, %v885_v7  ;;  %v867_v50 = vadd.s32 %v865_v38, %v863_v17 }
  0xaa   : > { %v890_v57 = vsel %vm889_vm3, 1, %v1358_v41  ;;  %v891_v58 = vadd.s32 %v885_v7, %v881_v8  ;;  %v811_v4 = vadd.s32 %v810_v40, %v801_v39  ;;  %v669_v6 = vsub.s32 %v1464_v18, %v668_v60 }
  0xab   : > { %v1577_v35 = vpop.f32.mrf.mxu3  ;;  %1284 = vst [vmem:[%s1568_s4] sm:$0xff] %v1283_v23   ;;  %v892_v63 = vadd.s32 %v890_v57, %v884_v5  ;;  %v754_v3 = vshrl.u32 %v753_v15, 3  ;;  %v886_v62 = vshrl.u32 %v1602_v9, 16  ;;  %v888_v17 = vshrl.u32 %v1607_v20, 16 }
  0xac   : > { %v525_v61 = vpop.f32.mrf.mxu2  ;;  %vm893_vm4 = vc.u32 %v891_v58, %v887_v33  ;;  %v812_v11 = vshrl.u32 %v811_v4, 3  ;;  %vm904_vm7 = vcmp.ne.s32.totalorder %v669_v6, 0  ;;  %vm913_vm8 = vcmp.lt.s32.totalorder %v669_v6, 0 }
  0xad   : > { %v345_v53 = vpop.f32.mrf.mxu0  ;;  %v546_v36 = vadd.f32 %v525_v61, %v395_v2  ;;  %v782_v61 = vadd.s32 %v781_v31, %v772_v30  ;;  %v894_v22 = vsel %vm893_vm4, 1, %v1358_v41  ;;  %v755_v2 = vmul.u32 9, %v754_v3  ;;  %vm1657_vm12 = vmand %vm913_vm8, %vm904_vm7 }
  0xae   : > { %v1589_v51 = vpop.f32.mrf.mxu1  ;;  %v397_v23 = vadd.f32 %v1551_v10, %v345_v53  ;;  %v1626_v10 = vsub.s32 %v1467_v19, %v1531_v45  ;;  %v859_v19 = vshrl.u32 %v1558_v27, 16  ;;  %v868_v45 = vadd.s32 %v867_v50, %v857_v52 }
  0xaf   : > { %v1630_v24 = vadd.f32 %v1577_v35, %v546_v36  ;;  %v783_v12 = vshrl.u32 %v782_v61, 3  ;;  %v840_v35 = vadd.s32 %v839_v56, %v830_v55  ;;  %v896_v8 = vadd.s32 %v894_v22, %v892_v63 }
  0xb0   : > { %vm905_vm5 = vcmp.ne.s32.totalorder %v1626_v10, 0  ;;  %vm914_vm6 = vcmp.lt.s32.totalorder %v1626_v10, 0  ;;  %v727_v27 = vsub.s32 %v1474_v26, %v726_v44  ;;  %v869_v16 = vadd.s32 %v868_v45, %v859_v19 }
  0xb1   : > { %v784_v13 = vmul.u32 9, %v783_v12  ;;  %v932_v9 = vadd.s32 9, %v1626_v10  ;;  %v841_v15 = vshrl.u32 %v840_v35, 3  ;;  %v897_v7 = vadd.s32 %v896_v8, %v886_v62  ;;  %vm1650_vm9 = vmand %vm914_vm6, %vm905_vm5 }
  0xb2   : > { %v756_v31 = vsub.s32 %v1486_v48, %v755_v2  ;;  %vm906_vm10 = vcmp.ne.s32.totalorder %v727_v27, 0  ;;  %vm915_vm11 = vcmp.lt.s32.totalorder %v727_v27, 0  ;;  %v813_v32 = vmul.u32 9, %v812_v11 }
  0xb3   : > { %v607_v25 = vpop.f32.mrf.mxu3  ;;  %v870_v38 = vshrl.u32 %v869_v16, 3  ;;  %v785_v20 = vsub.s32 %v1493_v59, %v784_v13  ;;  %v941_v33 = vsel %vm1650_vm9, %v932_v9, %v1626_v10  ;;  %v898_v36 = vadd.s32 %v897_v7, %v888_v17  ;;  %vm1665_vm13 = vmand %vm915_vm11, %vm906_vm10 }
  0xb4   : > { %v527_v46 = vpop.f32.mrf.mxu2  ;;  %vm907_vm14 = vcmp.ne.s32.totalorder %v756_v31, 0  ;;  %vm916_vm15 = vcmp.lt.s32.totalorder %v756_v31, 0  ;;  %v814_v52 = vsub.s32 %v1506_v14, %v813_v32  ;;  %v934_v58 = vadd.s32 9, %v756_v31 }
  0xb5   : > { %v348_v37 = vpop.f32.mrf.mxu0  ;;  %v547_v53 = vadd.f32 %v527_v46, %v397_v23  ;;  %v933_v23 = vadd.s32 9, %v727_v27  ;;  %v871_v57 = vmul.u32 9, %v870_v38  ;;  %vm908_vm0 = vcmp.ne.s32.totalorder %v785_v20, 0  ;;  %vm1679_vm3 = vmand %vm916_vm15, %vm907_vm14 }
  0xb6   : > { %v1618_v47 = vpop.f32.mrf.mxu1  ;;  %v400_v26 = vadd.f32 %v1589_v51, %v348_v37  ;;  %v842_v51 = vmul.u32 9, %v841_v15  ;;  %vm917_vm1 = vcmp.lt.s32.totalorder %v785_v20, 0  ;;  %vm950_vm2 = vcmp.ne.s32.totalorder %v941_v33, 8 }
  0xb7   : > { %v1632_v0 = vadd.f32 %v607_v25, %v547_v53  ;;  %v931_v25 = vadd.s32 9, %v669_v6  ;;  %v942_v10 = vsel %vm1665_vm13, %v933_v23, %v727_v27  ;;  %v899_v14 = vshrl.u32 %v898_v36, 3  ;;  %vm1688_vm5 = vmand %vm917_vm1, %vm908_vm0 }
  0xb8   : > { %v843_v53 = vsub.s32 %v1511_v21, %v842_v51  ;;  %v935_v55 = vadd.s32 9, %v785_v20  ;;  %vm909_vm6 = vcmp.ne.s32.totalorder %v814_v52, 0  ;;  %vm918_vm7 = vcmp.lt.s32.totalorder %v814_v52, 0 }
  0xb9   : > { %v1288_v1 = vpack.c.bf16 %v1632_v0, %v1630_v24  ;;  %v940_v59 = vsel %vm1657_vm12, %v931_v25, %v669_v6  ;;  %v872_v3 = vsub.s32 %v1528_v43, %v871_v57  ;;  %v1359_v22 = vmov 0.0   ;;  %vm1706_vm11 = vmand %vm918_vm7, %vm909_vm6 }
  0xba   : > { %vm949_vm4 = vcmp.ne.s32.totalorder %v940_v59, 8  ;;  %v1258_v44 = vsel %vm950_vm2, 1.0, %v1359_v22  ;;  %vm1694_vm8 = vcmp.ne.s32.totalorder %v942_v10, 8  ;;  %v943_v4 = vsel %vm1679_vm3, %v934_v58, %v756_v31 }
  0xbb   : > { %v610_v49 = vpop.f32.mrf.mxu3  ;;  %1300 = vst [vmem:[%s1568_s4 + $0x8] sm:$0xff] %v1288_v1   ;;  %v936_v6 = vadd.s32 9, %v814_v52  ;;  %vm910_vm9 = vcmp.ne.s32.totalorder %v843_v53, 0  ;;  %vm919_vm10 = vcmp.lt.s32.totalorder %v843_v53, 0  ;;  %v900_v1 = vmul.u32 9, %v899_v14 }
  0xbc   : > { %v530_v54 = vpop.f32.mrf.mxu2  ;;  %v1257_v43 = vsel %vm949_vm4, 1.0, %v1359_v22  ;;  %vm952_vm12 = vcmp.ne.s32.totalorder %v943_v4, 8  ;;  %v937_v8 = vadd.s32 9, %v843_v53  ;;  %vm911_vm13 = vcmp.ne.s32.totalorder %v872_v3, 0  ;;  %vm1718_vm15 = vmand %vm919_vm10, %vm910_vm9 }
  0xbd   : > { %v350_v41 = vpop.f32.mrf.mxu0  ;;  %v548_v39 = vadd.f32 %v530_v54, %v400_v26  ;;  %vm920_vm14 = vcmp.lt.s32.totalorder %v872_v3, 0  ;;  %v1259_v27 = vsel %vm1694_vm8, 1.0, %v1359_v22  ;;  %v945_v16 = vsel %vm1706_vm11, %v936_v6, %v814_v52 }
  0xbe   : > { %v1644_v18 = vpop.f32.mrf.mxu1  ;;  %v402_v37 = vadd.f32 %v1618_v47, %v350_v41  ;;  %v977_v41 = vmul.f32 %v1258_v44, %v1562_v29  ;;  %v938_v13 = vadd.s32 9, %v872_v3  ;;  %v901_v9 = vsub.s32 %v1573_v34, %v900_v1  ;;  %vm1727_vm1 = vmand %vm920_vm14, %vm911_vm13 }
  0xbf   : > { %v1684_v61 = vadd.f32 %v610_v49, %v548_v39  ;;  %v944_v49 = vsel %vm1688_vm5, %v935_v55, %v785_v20  ;;  %v976_v15 = vmul.f32 %v1257_v43, %v1560_v28  ;;  %v1260_v17 = vsel %vm952_vm12, 1.0, %v1359_v22 }
  0xc0   : > { %vm953_vm0 = vcmp.ne.s32.totalorder %v944_v49, 8  ;;  %v946_v25 = vsel %vm1718_vm15, %v937_v8, %v843_v53  ;;  %v1001_v30 = vmul.f32 %v977_v41, %v1562_v29  ;;  %vm954_vm2 = vcmp.ne.s32.totalorder %v945_v16, 8 }
  0xc1   : > { %v1261_v26 = vsel %vm953_vm0, 1.0, %v1359_v22  ;;  %v979_v32 = vmul.f32 %v1260_v17, %v1632_v0  ;;  %v947_v38 = vsel %vm1727_vm1, %v938_v13, %v872_v3  ;;  %vm912_vm3 = vcmp.ne.s32.totalorder %v901_v9, 0 }
  0xc2   : > { %vm921_vm4 = vcmp.lt.s32.totalorder %v901_v9, 0  ;;  %v1000_v42 = vmul.f32 %v976_v15, %v1560_v28  ;;  %vm1741_vm5 = vcmp.ne.s32.totalorder %v946_v25, 8  ;;  %v985_v33 = vadd.f32 %v977_v41, %v976_v15 }
  0xc3   : > { %v612_v5 = vpop.f32.mrf.mxu3  ;;  %v1262_v51 = vsel %vm954_vm2, 1.0, %v1359_v22  ;;  %v980_v39 = vmul.f32 %v1261_v26, %v1684_v61  ;;  %vm956_vm6 = vcmp.ne.s32.totalorder %v947_v38, 8  ;;  %vm1750_vm7 = vmand %vm921_vm4, %vm912_vm3 }
  0xc4   : > { %v532_v46 = vpop.f32.mrf.mxu2  ;;  %v1264_v47 = vsel %vm956_vm6, 1.0, %v1359_v22 }
  0xc5   : > { %v353_v40 = vpop.f32.mrf.mxu0  ;;  %v549_v60 = vadd.f32 %v532_v46, %v402_v37  ;;  %v939_v37 = vadd.s32 9, %v901_v9  ;;  %v1009_v46 = vadd.f32 %v1001_v30, %v1000_v42  ;;  %v1004_v14 = vmul.f32 %v980_v39, %v1684_v61 }
  0xc6   : > { %v1673_v50 = vpop.f32.mrf.mxu1  ;;  %v405_v54 = vadd.f32 %v1644_v18, %v353_v40  ;;  %v978_v18 = vmul.f32 %v1259_v27, %v1630_v24 }
  0xc7   : > { %v1686_v56 = vadd.f32 %v612_v5, %v549_v60  ;;  %v948_v53 = vsel %vm1750_vm7, %v939_v37, %v901_v9 }
  0xc8   : > { %v1002_v23 = vmul.f32 %v978_v18, %v1630_v24  ;;  %v986_v52 = vadd.f32 %v985_v33, %v978_v18  ;;  %v1003_v24 = vmul.f32 %v979_v32, %v1632_v0  ;;  %vm957_vm8 = vcmp.ne.s32.totalorder %v948_v53, 8 }
  0xc9   : > { %v1293_v19 = vpack.c.bf16 %v1686_v56, %v1684_v61  ;;  %v981_v57 = vmul.f32 %v1262_v51, %v1686_v56  ;;  %v1265_v61 = vsel %vm957_vm8, 1.0, %v1359_v22 }
  0xca   : > { %v1010_v60 = vadd.f32 %v1009_v46, %v1002_v23  ;;  %v987_v10 = vadd.f32 %v986_v52, %v979_v32 }
  0xcb   : > { %v615_v45 = vpop.f32.mrf.mxu3  ;;  %1301 = vst [vmem:[%s1568_s4 + $0x10] sm:$0xff] %v1293_v19   ;;  %v1005_v4 = vmul.f32 %v981_v57, %v1686_v56 }
  0xcc   : > { %v535_v62 = vpop.f32.mrf.mxu2  ;;  %v1011_v44 = vadd.f32 %v1010_v60, %v1003_v24  ;;  %v988_v21 = vadd.f32 %v987_v10, %v980_v39 }
  0xcd   : > { %v355_v35 = vpop.f32.mrf.mxu0  ;;  %v550_v31 = vadd.f32 %v535_v62, %v405_v54 }
  0xce   : > { %v409_v2 = vpop.f32.mrf.mxu1  ;;  %v407_v20 = vadd.f32 %v1673_v50, %v355_v35  ;;  %v1263_v50 = vsel %vm1741_vm5, 1.0, %v1359_v22  ;;  %v1012_v1 = vadd.f32 %v1011_v44, %v1004_v14  ;;  %v989_v43 = vadd.f32 %v988_v21, %v981_v57 }
  0xcf   : > { %v630_v40 = vadd.f32 %v615_v45, %v550_v31 }
  0xd0   : > { %v1013_v35 = vadd.f32 %v1012_v1, %v1005_v4 }
  0xd1   : > { %v982_v55 = vmul.f32 %v1263_v50, %v630_v40 }
  0xd3   : > { %v617_v34 = vpop.f32.mrf.mxu3  ;;  %v1006_v49 = vmul.f32 %v982_v55, %v630_v40  ;;  %v990_v62 = vadd.f32 %v989_v43, %v982_v55 }
  0xd4   : > { %v537_v36 = vpop.f32.mrf.mxu2 }
  0xd5   : > { %v358_v29 = vpop.f32.mrf.mxu0  ;;  %v551_v59 = vadd.f32 %v537_v36, %v407_v20  ;;  %v1014_v41 = vadd.f32 %v1013_v35, %v1006_v49 }
  0xd6   : > { %v411_v48 = vpop.f32.mrf.mxu1  ;;  %v410_v63 = vadd.f32 %v409_v2, %v358_v29 }
  0xd7   : > { %v631_v58 = vadd.f32 %v617_v34, %v551_v59 }
  0xd9   : > { %v1298_v0 = vpack.c.bf16 %v631_v58, %v630_v40  ;;  %v983_v19 = vmul.f32 %v1264_v47, %v631_v58 }
  0xdb   : > { %v620_v3 = vpop.f32.mrf.mxu3  ;;  %1302 = vst [vmem:[%s1568_s4 + $0x18] sm:$0xff] %v1298_v0   ;;  %v1007_v8 = vmul.f32 %v983_v19, %v631_v58  ;;  %v991_v27 = vadd.f32 %v990_v62, %v983_v19 }
  0xdc   : > { %v540_v6 = vpop.f32.mrf.mxu2 }
  0xdd   : > { %v360_v45 = vpop.f32.mrf.mxu0  ;;  %v552_v12 = vadd.f32 %v540_v6, %v410_v63  ;;  %v1015_v16 = vadd.f32 %v1014_v41, %v1007_v8 }
  0xdf   : > { %v632_v2 = vadd.f32 %v620_v3, %v552_v12 }
  0xe1   : > { %v984_v56 = vmul.f32 %v1265_v61, %v632_v2  ;;  %v1032_v54 = vpack.c.bf16 %v632_v2, %v632_v2 }
  0xe3   : > { %v622_v11 = vpop.f32.mrf.mxu3  ;;  %v992_v13 = vadd.f32 %v991_v27, %v984_v56  ;;  %v1008_v9 = vmul.f32 %v984_v56, %v632_v2  ;;  %1041 = vst [vmem:[%s1568_s4 + $0x20] sm:$0xf] %v1032_v54 }
  0xe4   : > { %v542_v15 = vpop.f32.mrf.mxu2 }
  0xe5   : > { %v993_v17 = vrot.slane %v992_v13, 4  ;;  %v1016_v7 = vadd.f32 %v1015_v16, %v1008_v9 }
  0xe7   : > { %v994_v18 = vadd.f32 %v993_v17, %v992_v13  ;;  %v1017_v25 = vrot.slane %v1016_v7, 4 }
  0xe9   : > { %v995_v22 = vrot.slane %v994_v18, 2  ;;  %v1018_v30 = vadd.f32 %v1017_v25, %v1016_v7 }
  0xeb   : > { %v996_v26 = vadd.f32 %v995_v22, %v994_v18  ;;  %v1019_v31 = vrot.slane %v1018_v30, 2 }
  0xed   : > { %v997_v34 = vrot.slane %v996_v26, 1  ;;  %v1020_v32 = vadd.f32 %v1019_v31, %v1018_v30 }
  0xef   : > { %v998_v38 = vadd.f32 %v997_v34, %v996_v26  ;;  %v1021_v42 = vrot.slane %v1020_v32, 1 }
  0xf1   : > { %999 = vst [vmem:[%s225_s8] sm:$0x1] %v998_v38  ;;  %v1022_v20 = vadd.f32 %v1021_v42, %v1020_v32 }
  0xf3   : > { %1023 = vst [vmem:[%s225_s8 + $0x1] sm:$0x1] %v1022_v20 }
  0xf4 PF: > { %s14_s14 = sadd.s32 1, %s1356_s14   ;;  %s1810_s12 = smov %s1352_s13 }
  0xf5   : > { %p11_p5 = scmp.ge.s32.totalorder %s14_s14, 4   ;;  %s1811_s13 = smov %s1813_s15 }
  0xf7   :  { %13 = sbr.rel (!%p11_p5) target bundleno = 2 (0x2), region = 73 }

</bundles_post_ra>
